<compile_context>
chip_gen: v7x
topology: tpu7x:2x2x1
jax: 0.10.0
libtpu: 0.0.40
codegen_flags: <defaults>
</compile_context>

<pallas_src>
import functools
import math

import jax
import jax.numpy as jnp
from jax.experimental import pallas as pl
from jax.experimental.pallas import tpu as pltpu


def _round_up(x, m):
    return ((x + m - 1) // m) * m


_VMEM_BUDGET = 40 * 1024 * 1024  # stay safe on v7x (64 MiB physical per TC)


# --------------------------------------------------------------------------
# Kernel
# --------------------------------------------------------------------------
def _autoencoder_kernel(
    x_ref,
    # encoder (eval-mode BN folded into the following Linear host-side)
    ew1_ref, eb1_ref, ew2_ref, eb2_ref, ew3_ref, eb3_ref,
    # decoder (dw1 fused with the classifier weight into one 256-wide matrix)
    dcw_ref, dcb_ref, dw2_ref, db2_ref, dw3_ref, db3_ref,
    # outputs
    latent_ref, recon_ref,
    *, cls_col,
):
    def linear(h_bf16, w_ref, b_ref):
        # bf16 x bf16 on the MXU, f32 accumulation, f32 bias epilogue.
        return jnp.dot(h_bf16, w_ref[...],
                       preferred_element_type=jnp.float32) + b_ref[...]

    def relu_bf16(y_f32):
        return jnp.maximum(y_f32, 0.0).astype(jnp.bfloat16)

    x = x_ref[...].astype(jnp.bfloat16)   # in-kernel cast (no host round trip)

    # ---- encoder: Linear->ReLU->(BN folded)->(Dropout=id) x2 -> Linear
    h = relu_bf16(linear(x, ew1_ref, eb1_ref))
    h = relu_bf16(linear(h, ew2_ref, eb2_ref))
    latent = linear(h, ew3_ref, eb3_ref)          # f32 (TB, d_lat)
    lat_b = latent.astype(jnp.bfloat16)

    # ---- decoder layer 1 + classifier as a single 256-wide MXU pass
    dc = linear(lat_b, dcw_ref, dcb_ref)          # f32 (TB, 256)
    d = relu_bf16(dc[:, :128])                    # decoder branch
    logit = dc[:, 128:129]                        # classifier logit (TB, 1)
    # sigmoid via EUP exp + approx reciprocal (both off the VALU slots)
    cls = pl.reciprocal(1.0 + jnp.exp(-logit), approx=True)

    # ---- rest of the decoder: ReLU->(BN folded)->Linear -> output (bf16)
    d = relu_bf16(linear(d, dw2_ref, db2_ref))
    recon_ref[...] = linear(d, dw3_ref, db3_ref).astype(jnp.bfloat16)

    # ---- latent slab: real latent in columns [:bottleneck]; classification
    # stashed in padding column `cls_col` (removes a third output stream).
    col = jax.lax.broadcasted_iota(jnp.int32, latent.shape, dimension=1)
    latent_ref[...] = jnp.where(col == cls_col, cls, latent).astype(jnp.bfloat16)


# --------------------------------------------------------------------------
# Host-side parameter prep: BN fold, dw1+classifier fusion, pad, bf16 cast.
# Run ONCE and reuse the result across forward calls.
# --------------------------------------------------------------------------
def _fold_bn_into_next_linear(scale, shift, w_next, b_next):
    # (h*scale + shift) @ W + b  ==  h @ (scale^T * W) + (shift @ W + b)
    w_f = scale.reshape(-1, 1) * w_next
    b_f = shift @ w_next + b_next
    return w_f, b_f


def _pad2(a, rows, cols):
    return jnp.pad(a, ((0, rows - a.shape[0]), (0, cols - a.shape[1])))


def prepare_params(params, input_dim, bottleneck_dim):
    d_in_p = _round_up(input_dim, 128)
    # latent slab width: padded bottleneck with at least one spare column to
    # hold the classification result.
    d_lat = _round_up(bottleneck_dim + 1, 128)
    cls_col = bottleneck_dim

    p = params
    ew2, eb2 = _fold_bn_into_next_linear(p["es1"], p["et1"], p["ew2"], p["eb2"])
    ew3, eb3 = _fold_bn_into_next_linear(p["es2"], p["et2"], p["ew3"], p["eb3"])
    dw2, db2 = _fold_bn_into_next_linear(p["ds1"], p["dt1"], p["dw2"], p["db2"])
    dw3, db3 = _fold_bn_into_next_linear(p["ds2"], p["dt2"], p["dw3"], p["db3"])

    # fused decoder-layer-1 + classifier weight/bias: (d_lat, 256) / (1, 256)
    dcw = jnp.concatenate([_pad2(p["dw1"], d_lat, 128),
                           _pad2(p["cw"], d_lat, 128)], axis=1)
    dcb = jnp.concatenate([_pad2(p["db1"], 1, 128),
                           _pad2(p["cb"], 1, 128)], axis=1)

    bf = lambda a: a.astype(jnp.bfloat16)
    prepared = dict(
        ew1=bf(_pad2(p["ew1"], d_in_p, 256)), eb1=p["eb1"],
        ew2=bf(ew2), eb2=eb2,
        ew3=bf(_pad2(ew3, 128, d_lat)), eb3=_pad2(eb3, 1, d_lat),
        dcw=bf(dcw), dcb=dcb,
        dw2=bf(dw2), db2=db2,
        dw3=bf(_pad2(dw3, 256, d_in_p)), db3=_pad2(db3, 1, d_in_p),
    )
    meta = dict(input_dim=input_dim, bottleneck_dim=bottleneck_dim,
                d_in_p=d_in_p, d_lat=d_lat, cls_col=cls_col)
    return prepared, meta


# --------------------------------------------------------------------------
# Tile selection (VMEM-aware, v7x megacore-friendly)
# --------------------------------------------------------------------------
def _vmem_estimate(tb, d_in_p, d_lat, x_itemsize, weight_bytes):
    stream = 2 * tb * (d_in_p * x_itemsize        # x (double-buffered)
                       + d_lat * 2                # latent slab (bf16)
                       + d_in_p * 2)              # reconstruction (bf16)
    interm = 4 * tb * 256 * 4                     # live f32 intermediates
    return stream + interm + weight_bytes


def _choose_batch_tile(B, batch_tile, d_in_p, d_lat, x_itemsize, weight_bytes):
    b_min = _round_up(B, 16)                      # bf16 packs 16 rows/sublane
    tb = min(batch_tile, b_min)
    # guarantee >= 2 grid steps when the batch is large enough (v7x: 2 TCs)
    if tb == b_min and b_min >= 256:
        tb = _round_up((b_min + 1) // 2, 16)
    # shrink until the working set fits the VMEM budget
    while (tb > 128 and
           _vmem_estimate(tb, d_in_p, d_lat, x_itemsize, weight_bytes)
           > _VMEM_BUDGET):
        tb = max(128, _round_up(tb // 2, 16))
    b_pad = _round_up(b_min, tb)
    return tb, b_pad


# --------------------------------------------------------------------------
# Wrapper
# --------------------------------------------------------------------------
def autoencoder_forward(x, prepared, meta, *, batch_tile=2048):
    """x: (B, input_dim) f32. prepared/meta: output of prepare_params()."""
    B, input_dim = x.shape
    assert input_dim == meta["input_dim"]
    bottleneck_dim = meta["bottleneck_dim"]
    d_in_p, d_lat, cls_col = meta["d_in_p"], meta["d_lat"], meta["cls_col"]

    w = prepared
    weight_bytes = sum(int(a.size) * a.dtype.itemsize for a in w.values())

    tb, b_pad = _choose_batch_tile(B, batch_tile, d_in_p, d_lat,
                                   x.dtype.itemsize, weight_bytes)
    grid = (b_pad // tb,)

    # pad only when required; pad in bf16 so the kernel-side read is halved.
    if (d_in_p != input_dim) or (b_pad != B):
        x_in = jnp.pad(x.astype(jnp.bfloat16),
                       ((0, b_pad - B), (0, d_in_p - input_dim)))
    else:
        x_in = x  # unpadded f32; the kernel casts to bf16

    inputs = [
        x_in,
        w["ew1"], w["eb1"], w["ew2"], w["eb2"], w["ew3"], w["eb3"],
        w["dcw"], w["dcb"], w["dw2"], w["db2"], w["dw3"], w["db3"],
    ]

    def tile_spec(feat):
        return pl.BlockSpec((tb, feat), lambda i: (i, 0))

    def resident(a):
        # constant index_map -> weight/bias stays VMEM-resident across steps
        return pl.BlockSpec(a.shape, lambda i: (0, 0))

    in_specs = [tile_spec(d_in_p)] + [resident(a) for a in inputs[1:]]

    out_shapes = (
        jax.ShapeDtypeStruct((b_pad, d_lat), jnp.bfloat16),   # latent (+cls)
        jax.ShapeDtypeStruct((b_pad, d_in_p), jnp.bfloat16),  # reconstruction
    )
    out_specs = (tile_spec(d_lat), tile_spec(d_in_p))

    flops = 2 * b_pad * (
        d_in_p * 256 + 256 * 128 + 128 * d_lat        # encoder
        + d_lat * 256 + 128 * 256 + 256 * d_in_p      # decoder (+classifier)
    )
    bytes_accessed = (
        int(x_in.size) * x_in.dtype.itemsize
        + weight_bytes
        + sum(math.prod(s.shape) * 2 for s in out_shapes)
    )

    kernel = functools.partial(_autoencoder_kernel, cls_col=cls_col)

    latent_p, recon_p = pl.pallas_call(
        kernel,
        out_shape=out_shapes,
        grid=grid,
        in_specs=in_specs,
        out_specs=out_specs,
        compiler_params=pltpu.CompilerParams(
            dimension_semantics=("parallel",),
            vmem_limit_bytes=_VMEM_BUDGET + 8 * 1024 * 1024,
        ),
        cost_estimate=pl.CostEstimate(
            flops=flops,
            transcendentals=b_pad,
            bytes_accessed=bytes_accessed,
        ),
    )(*inputs)

    latent = latent_p[:B, :bottleneck_dim]
    recon = recon_p[:B, :input_dim]
    cls = latent_p[:B, cls_col:cls_col + 1]
    return latent, recon, cls


# --------------------------------------------------------------------------
# Deterministic PyTorch-style parameter construction + pure-JAX reference
# --------------------------------------------------------------------------
def _linear_params(key, in_dim, out_dim):
    """nn.Linear init U(-1/sqrt(in), 1/sqrt(in)); returns W^T (in,out), b (1,out)."""
    kw, kb = jax.random.split(key)
    bound = 1.0 / jnp.sqrt(jnp.float32(in_dim))
    w_t = jax.random.uniform(kw, (in_dim, out_dim), jnp.float32, -bound, bound)
    b = jax.random.uniform(kb, (1, out_dim), jnp.float32, -bound, bound)
    return w_t, b


def _bn_params(key, dim, eps=1e-5):
    """Eval-mode BatchNorm1d folded to per-feature scale/shift."""
    kg, kb = jax.random.split(key)
    gamma = 1.0 + 0.1 * jax.random.normal(kg, (1, dim), jnp.float32)
    beta = 0.1 * jax.random.normal(kb, (1, dim), jnp.float32)
    running_mean = jnp.zeros((1, dim), jnp.float32)
    running_var = jnp.ones((1, dim), jnp.float32)
    scale = gamma / jnp.sqrt(running_var + eps)
    shift = beta - running_mean * scale
    return scale, shift


def make_params(key, input_dim, bottleneck_dim):
    keys = jax.random.split(key, 12)
    p = {}
    p["ew1"], p["eb1"] = _linear_params(keys[0], input_dim, 256)
    p["es1"], p["et1"] = _bn_params(keys[1], 256)
    p["ew2"], p["eb2"] = _linear_params(keys[2], 256, 128)
    p["es2"], p["et2"] = _bn_params(keys[3], 128)
    p["ew3"], p["eb3"] = _linear_params(keys[4], 128, bottleneck_dim)
    p["dw1"], p["db1"] = _linear_params(keys[5], bottleneck_dim, 128)
    p["ds1"], p["dt1"] = _bn_params(keys[6], 128)
    p["dw2"], p["db2"] = _linear_params(keys[7], 128, 256)
    p["ds2"], p["dt2"] = _bn_params(keys[8], 256)
    p["dw3"], p["db3"] = _linear_params(keys[9], 256, input_dim)
    p["cw"], p["cb"] = _linear_params(keys[10], bottleneck_dim, 1)
    return p


def _reference_forward(x, p):
    """Pure-JAX f32 reference of the same eval-mode forward (unfolded params)."""
    h = jnp.maximum(x @ p["ew1"] + p["eb1"], 0.0) * p["es1"] + p["et1"]
    h = jnp.maximum(h @ p["ew2"] + p["eb2"], 0.0) * p["es2"] + p["et2"]
    latent = h @ p["ew3"] + p["eb3"]
    d = jnp.maximum(latent @ p["dw1"] + p["db1"], 0.0) * p["ds1"] + p["dt1"]
    d = jnp.maximum(d @ p["dw2"] + p["db2"], 0.0) * p["ds2"] + p["dt2"]
    recon = d @ p["dw3"] + p["db3"]
    cls = jax.nn.sigmoid(latent @ p["cw"] + p["cb"])
    return latent, recon, cls


if __name__ == "__main__":
    key = jax.random.PRNGKey(0)
    k_x, k_p = jax.random.split(key)

    B, INPUT_DIM, BOTTLENECK_DIM = 8, 32, 16
    x = jax.random.normal(k_x, (B, INPUT_DIM), jnp.float32)
    params = make_params(k_p, INPUT_DIM, BOTTLENECK_DIM)

    # one-time prep (BN folding, classifier fusion, padding, bf16 cast)
    prepared, meta = prepare_params(params, INPUT_DIM, BOTTLENECK_DIM)

    latent, recon, cls = autoencoder_forward(x, prepared, meta)
    jax.block_until_ready((latent, recon, cls))

    # sanity-check against f32 pure-JAX reference (bf16 MXU inputs + bf16
    # output stores -> loosened tolerances)
    lr, rr, cr = _reference_forward(x, params)
    assert latent.shape == (B, BOTTLENECK_DIM)
    assert recon.shape == (B, INPUT_DIM)
    assert cls.shape == (B, 1)
    assert jnp.allclose(latent.astype(jnp.float32), lr, atol=4e-2, rtol=4e-2)
    assert jnp.allclose(recon.astype(jnp.float32), rr, atol=4e-2, rtol=4e-2)
    assert jnp.allclose(cls.astype(jnp.float32), cr, atol=2.5e-2, rtol=2.5e-2)

    print("KERNEL_OK")
</pallas_src>

<mosaic_0001>
module attributes {stable_mosaic.version = 11 : i64} {
  func.func @_autoencoder_kernel(%arg0: i32, %arg1: memref<16x128xbf16, #tpu.memory_space<vmem>>, %arg2: memref<128x256xbf16, #tpu.memory_space<vmem>>, %arg3: memref<1x256xf32, #tpu.memory_space<vmem>>, %arg4: memref<256x128xbf16, #tpu.memory_space<vmem>>, %arg5: memref<1x128xf32, #tpu.memory_space<vmem>>, %arg6: memref<128x128xbf16, #tpu.memory_space<vmem>>, %arg7: memref<1x128xf32, #tpu.memory_space<vmem>>, %arg8: memref<128x256xbf16, #tpu.memory_space<vmem>>, %arg9: memref<1x256xf32, #tpu.memory_space<vmem>>, %arg10: memref<128x256xbf16, #tpu.memory_space<vmem>>, %arg11: memref<1x256xf32, #tpu.memory_space<vmem>>, %arg12: memref<256x128xbf16, #tpu.memory_space<vmem>>, %arg13: memref<1x128xf32, #tpu.memory_space<vmem>>, %arg14: memref<16x128xbf16, #tpu.memory_space<vmem>>, %arg15: memref<16x128xbf16, #tpu.memory_space<vmem>>) attributes {dimension_semantics = [#tpu.dimension_semantics<parallel>], iteration_bounds = array<i64: 1>, scalar_prefetch = 0 : i64, scratch_operands = 0 : i64, tpu.core_type = #tpu.core_type<tc>, window_params = [{transform_indices = @transform_0, window_bounds = array<i64: 16, 128>}, {pipeline_mode = #tpu.pipeline_mode<synchronous>, transform_indices = @transform_1, window_bounds = array<i64: 128, 256>}, {pipeline_mode = #tpu.pipeline_mode<synchronous>, transform_indices = @transform_2, window_bounds = array<i64: 1, 256>}, {pipeline_mode = #tpu.pipeline_mode<synchronous>, transform_indices = @transform_3, window_bounds = array<i64: 256, 128>}, {pipeline_mode = #tpu.pipeline_mode<synchronous>, transform_indices = @transform_4, window_bounds = array<i64: 1, 128>}, {pipeline_mode = #tpu.pipeline_mode<synchronous>, transform_indices = @transform_5, window_bounds = array<i64: 128, 128>}, {pipeline_mode = #tpu.pipeline_mode<synchronous>, transform_indices = @transform_6, window_bounds = array<i64: 1, 128>}, {pipeline_mode = #tpu.pipeline_mode<synchronous>, transform_indices = @transform_7, window_bounds = array<i64: 128, 256>}, {pipeline_mode = #tpu.pipeline_mode<synchronous>, transform_indices = @transform_8, window_bounds = array<i64: 1, 256>}, {pipeline_mode = #tpu.pipeline_mode<synchronous>, transform_indices = @transform_9, window_bounds = array<i64: 128, 256>}, {pipeline_mode = #tpu.pipeline_mode<synchronous>, transform_indices = @transform_10, window_bounds = array<i64: 1, 256>}, {pipeline_mode = #tpu.pipeline_mode<synchronous>, transform_indices = @transform_11, window_bounds = array<i64: 256, 128>}, {pipeline_mode = #tpu.pipeline_mode<synchronous>, transform_indices = @transform_12, window_bounds = array<i64: 1, 128>}, {transform_indices = @transform_13, window_bounds = array<i64: 16, 128>}, {transform_indices = @transform_14, window_bounds = array<i64: 16, 128>}]} {
    %c0 = arith.constant 0 : index
    %c0_0 = arith.constant 0 : index
    %0 = vector.load %arg1[%c0, %c0_0] : memref<16x128xbf16, #tpu.memory_space<vmem>>, vector<16x128xbf16>
    %c0_1 = arith.constant 0 : index
    %c0_2 = arith.constant 0 : index
    %1 = vector.load %arg2[%c0_1, %c0_2] : memref<128x256xbf16, #tpu.memory_space<vmem>>, vector<128x256xbf16>
    %cst = arith.constant dense<0.000000e+00> : vector<16x256xf32>
    %2 = tpu.matmul %0, %1, %cst {dimension_numbers = #tpu.dot_dimension_numbers<[1], [0], [0], [1], [0, 0, 1, 1], [], []>} : vector<16x128xbf16>, vector<128x256xbf16>, vector<16x256xf32> -> vector<16x256xf32>
    %c0_3 = arith.constant 0 : index
    %c0_4 = arith.constant 0 : index
    %3 = vector.load %arg3[%c0_3, %c0_4] : memref<1x256xf32, #tpu.memory_space<vmem>>, vector<1x256xf32>
    %4 = vector.broadcast %3 : vector<1x256xf32> to vector<16x256xf32>
    %5 = arith.addf %2, %4 : vector<16x256xf32>
    %cst_5 = arith.constant 0.000000e+00 : f32
    %6 = vector.broadcast %cst_5 : f32 to vector<16x256xf32>
    %7 = arith.maximumf %5, %6 : vector<16x256xf32>
    %8 = arith.truncf %7 : vector<16x256xf32> to vector<16x256xbf16>
    %c0_6 = arith.constant 0 : index
    %c0_7 = arith.constant 0 : index
    %9 = vector.load %arg4[%c0_6, %c0_7] : memref<256x128xbf16, #tpu.memory_space<vmem>>, vector<256x128xbf16>
    %cst_8 = arith.constant dense<0.000000e+00> : vector<16x128xf32>
    %10 = tpu.matmul %8, %9, %cst_8 {dimension_numbers = #tpu.dot_dimension_numbers<[1], [0], [0], [1], [0, 0, 1, 1], [], []>} : vector<16x256xbf16>, vector<256x128xbf16>, vector<16x128xf32> -> vector<16x128xf32>
    %c0_9 = arith.constant 0 : index
    %c0_10 = arith.constant 0 : index
    %11 = vector.load %arg5[%c0_9, %c0_10] : memref<1x128xf32, #tpu.memory_space<vmem>>, vector<1x128xf32>
    %12 = vector.broadcast %11 : vector<1x128xf32> to vector<16x128xf32>
    %13 = arith.addf %10, %12 : vector<16x128xf32>
    %cst_11 = arith.constant 0.000000e+00 : f32
    %14 = vector.broadcast %cst_11 : f32 to vector<16x128xf32>
    %15 = arith.maximumf %13, %14 : vector<16x128xf32>
    %16 = arith.truncf %15 : vector<16x128xf32> to vector<16x128xbf16>
    %c0_12 = arith.constant 0 : index
    %c0_13 = arith.constant 0 : index
    %17 = vector.load %arg6[%c0_12, %c0_13] : memref<128x128xbf16, #tpu.memory_space<vmem>>, vector<128x128xbf16>
    %cst_14 = arith.constant dense<0.000000e+00> : vector<16x128xf32>
    %18 = tpu.matmul %16, %17, %cst_14 {dimension_numbers = #tpu.dot_dimension_numbers<[1], [0], [0], [1], [0, 0, 1, 1], [], []>} : vector<16x128xbf16>, vector<128x128xbf16>, vector<16x128xf32> -> vector<16x128xf32>
    %c0_15 = arith.constant 0 : index
    %c0_16 = arith.constant 0 : index
    %19 = vector.load %arg7[%c0_15, %c0_16] : memref<1x128xf32, #tpu.memory_space<vmem>>, vector<1x128xf32>
    %20 = vector.broadcast %19 : vector<1x128xf32> to vector<16x128xf32>
    %21 = arith.addf %18, %20 : vector<16x128xf32>
    %22 = arith.truncf %21 : vector<16x128xf32> to vector<16x128xbf16>
    %c0_17 = arith.constant 0 : index
    %c0_18 = arith.constant 0 : index
    %23 = vector.load %arg8[%c0_17, %c0_18] : memref<128x256xbf16, #tpu.memory_space<vmem>>, vector<128x256xbf16>
    %cst_19 = arith.constant dense<0.000000e+00> : vector<16x256xf32>
    %24 = tpu.matmul %22, %23, %cst_19 {dimension_numbers = #tpu.dot_dimension_numbers<[1], [0], [0], [1], [0, 0, 1, 1], [], []>} : vector<16x128xbf16>, vector<128x256xbf16>, vector<16x256xf32> -> vector<16x256xf32>
    %c0_20 = arith.constant 0 : index
    %c0_21 = arith.constant 0 : index
    %25 = vector.load %arg9[%c0_20, %c0_21] : memref<1x256xf32, #tpu.memory_space<vmem>>, vector<1x256xf32>
    %26 = vector.broadcast %25 : vector<1x256xf32> to vector<16x256xf32>
    %27 = arith.addf %24, %26 : vector<16x256xf32>
    %28 = vector.extract_strided_slice %27 {offsets = [0, 0], sizes = [16, 128], strides = [1, 1]} : vector<16x256xf32> to vector<16x128xf32>
    %cst_22 = arith.constant 0.000000e+00 : f32
    %29 = vector.broadcast %cst_22 : f32 to vector<16x128xf32>
    %30 = arith.maximumf %28, %29 : vector<16x128xf32>
    %31 = arith.truncf %30 : vector<16x128xf32> to vector<16x128xbf16>
    %32 = vector.extract_strided_slice %27 {offsets = [0, 128], sizes = [16, 1], strides = [1, 1]} : vector<16x256xf32> to vector<16x1xf32>
    %cst_23 = arith.constant 0.000000e+00 : f32
    %33 = vector.broadcast %cst_23 : f32 to vector<16x1xf32>
    %34 = arith.subf %33, %32 : vector<16x1xf32>
    %35 = math.exp %34 : vector<16x1xf32>
    %cst_24 = arith.constant 1.000000e+00 : f32
    %36 = vector.broadcast %cst_24 : f32 to vector<16x1xf32>
    %37 = arith.addf %36, %35 : vector<16x1xf32>
    %38 = tpu.reciprocal %37 {approx = true} : vector<16x1xf32> -> vector<16x1xf32>
    %c0_25 = arith.constant 0 : index
    %c0_26 = arith.constant 0 : index
    %39 = vector.load %arg10[%c0_25, %c0_26] : memref<128x256xbf16, #tpu.memory_space<vmem>>, vector<128x256xbf16>
    %cst_27 = arith.constant dense<0.000000e+00> : vector<16x256xf32>
    %40 = tpu.matmul %31, %39, %cst_27 {dimension_numbers = #tpu.dot_dimension_numbers<[1], [0], [0], [1], [0, 0, 1, 1], [], []>} : vector<16x128xbf16>, vector<128x256xbf16>, vector<16x256xf32> -> vector<16x256xf32>
    %c0_28 = arith.constant 0 : index
    %c0_29 = arith.constant 0 : index
    %41 = vector.load %arg11[%c0_28, %c0_29] : memref<1x256xf32, #tpu.memory_space<vmem>>, vector<1x256xf32>
    %42 = vector.broadcast %41 : vector<1x256xf32> to vector<16x256xf32>
    %43 = arith.addf %40, %42 : vector<16x256xf32>
    %cst_30 = arith.constant 0.000000e+00 : f32
    %44 = vector.broadcast %cst_30 : f32 to vector<16x256xf32>
    %45 = arith.maximumf %43, %44 : vector<16x256xf32>
    %46 = arith.truncf %45 : vector<16x256xf32> to vector<16x256xbf16>
    %c0_31 = arith.constant 0 : index
    %c0_32 = arith.constant 0 : index
    %47 = vector.load %arg12[%c0_31, %c0_32] : memref<256x128xbf16, #tpu.memory_space<vmem>>, vector<256x128xbf16>
    %cst_33 = arith.constant dense<0.000000e+00> : vector<16x128xf32>
    %48 = tpu.matmul %46, %47, %cst_33 {dimension_numbers = #tpu.dot_dimension_numbers<[1], [0], [0], [1], [0, 0, 1, 1], [], []>} : vector<16x256xbf16>, vector<256x128xbf16>, vector<16x128xf32> -> vector<16x128xf32>
    %c0_34 = arith.constant 0 : index
    %c0_35 = arith.constant 0 : index
    %49 = vector.load %arg13[%c0_34, %c0_35] : memref<1x128xf32, #tpu.memory_space<vmem>>, vector<1x128xf32>
    %50 = vector.broadcast %49 : vector<1x128xf32> to vector<16x128xf32>
    %51 = arith.addf %48, %50 : vector<16x128xf32>
    %52 = arith.truncf %51 : vector<16x128xf32> to vector<16x128xbf16>
    %c0_36 = arith.constant 0 : index
    %c0_37 = arith.constant 0 : index
    %53 = vector.load %arg15[%c0_36, %c0_37] : memref<16x128xbf16, #tpu.memory_space<vmem>>, vector<16x128xbf16>
    tpu.vector_store %arg15[%c0_36, %c0_37], %52 {strides = array<i32>} : memref<16x128xbf16, #tpu.memory_space<vmem>>, vector<16x128xbf16>,
    %54 = tpu.iota {dimensions = array<i32: 1>} : vector<16x128xi32>
    %c16_i32 = arith.constant 16 : i32
    %55 = vector.broadcast %c16_i32 : i32 to vector<16x128xi32>
    %56 = arith.cmpi eq, %54, %55 : vector<16x128xi32>
    %57 = vector.shape_cast %38 : vector<16x1xf32> to vector<16x1xf32>
    %58 = vector.broadcast %57 : vector<16x1xf32> to vector<16x128xf32>
    %59 = arith.select %56, %58, %21 : vector<16x128xi1>, vector<16x128xf32>
    %60 = arith.truncf %59 : vector<16x128xf32> to vector<16x128xbf16>
    %c0_38 = arith.constant 0 : index
    %c0_39 = arith.constant 0 : index
    %61 = vector.load %arg14[%c0_38, %c0_39] : memref<16x128xbf16, #tpu.memory_space<vmem>>, vector<16x128xbf16>
    tpu.vector_store %arg14[%c0_38, %c0_39], %60 {strides = array<i32>} : memref<16x128xbf16, #tpu.memory_space<vmem>>, vector<16x128xbf16>,
    return
  }
  func.func @transform_0(%arg0: i32) -> (i32, i32) {
    %c0_i32 = arith.constant 0 : i32
    %c0_i32_0 = arith.constant 0 : i32
    return %arg0, %c0_i32 : i32, i32
  }
  func.func @transform_1(%arg0: i32) -> (i32, i32) {
    %c0_i32 = arith.constant 0 : i32
    %c0_i32_0 = arith.constant 0 : i32
    %c0_i32_1 = arith.constant 0 : i32
    return %c0_i32, %c0_i32_0 : i32, i32
  }
  func.func @transform_2(%arg0: i32) -> (i32, i32) {
    %c0_i32 = arith.constant 0 : i32
    %c0_i32_0 = arith.constant 0 : i32
    %c0_i32_1 = arith.constant 0 : i32
    return %c0_i32, %c0_i32_0 : i32, i32
  }
  func.func @transform_3(%arg0: i32) -> (i32, i32) {
    %c0_i32 = arith.constant 0 : i32
    %c0_i32_0 = arith.constant 0 : i32
    %c0_i32_1 = arith.constant 0 : i32
    return %c0_i32, %c0_i32_0 : i32, i32
  }
  func.func @transform_4(%arg0: i32) -> (i32, i32) {
    %c0_i32 = arith.constant 0 : i32
    %c0_i32_0 = arith.constant 0 : i32
    %c0_i32_1 = arith.constant 0 : i32
    return %c0_i32, %c0_i32_0 : i32, i32
  }
  func.func @transform_5(%arg0: i32) -> (i32, i32) {
    %c0_i32 = arith.constant 0 : i32
    %c0_i32_0 = arith.constant 0 : i32
    %c0_i32_1 = arith.constant 0 : i32
    return %c0_i32, %c0_i32_0 : i32, i32
  }
  func.func @transform_6(%arg0: i32) -> (i32, i32) {
    %c0_i32 = arith.constant 0 : i32
    %c0_i32_0 = arith.constant 0 : i32
    %c0_i32_1 = arith.constant 0 : i32
    return %c0_i32, %c0_i32_0 : i32, i32
  }
  func.func @transform_7(%arg0: i32) -> (i32, i32) {
    %c0_i32 = arith.constant 0 : i32
    %c0_i32_0 = arith.constant 0 : i32
    %c0_i32_1 = arith.constant 0 : i32
    return %c0_i32, %c0_i32_0 : i32, i32
  }
  func.func @transform_8(%arg0: i32) -> (i32, i32) {
    %c0_i32 = arith.constant 0 : i32
    %c0_i32_0 = arith.constant 0 : i32
    %c0_i32_1 = arith.constant 0 : i32
    return %c0_i32, %c0_i32_0 : i32, i32
  }
  func.func @transform_9(%arg0: i32) -> (i32, i32) {
    %c0_i32 = arith.constant 0 : i32
    %c0_i32_0 = arith.constant 0 : i32
    %c0_i32_1 = arith.constant 0 : i32
    return %c0_i32, %c0_i32_0 : i32, i32
  }
  func.func @transform_10(%arg0: i32) -> (i32, i32) {
    %c0_i32 = arith.constant 0 : i32
    %c0_i32_0 = arith.constant 0 : i32
    %c0_i32_1 = arith.constant 0 : i32
    return %c0_i32, %c0_i32_0 : i32, i32
  }
  func.func @transform_11(%arg0: i32) -> (i32, i32) {
    %c0_i32 = arith.constant 0 : i32
    %c0_i32_0 = arith.constant 0 : i32
    %c0_i32_1 = arith.constant 0 : i32
    return %c0_i32, %c0_i32_0 : i32, i32
  }
  func.func @transform_12(%arg0: i32) -> (i32, i32) {
    %c0_i32 = arith.constant 0 : i32
    %c0_i32_0 = arith.constant 0 : i32
    %c0_i32_1 = arith.constant 0 : i32
    return %c0_i32, %c0_i32_0 : i32, i32
  }
  func.func @transform_13(%arg0: i32) -> (i32, i32) {
    %c0_i32 = arith.constant 0 : i32
    %c0_i32_0 = arith.constant 0 : i32
    return %arg0, %c0_i32 : i32, i32
  }
  func.func @transform_14(%arg0: i32) -> (i32, i32) {
    %c0_i32 = arith.constant 0 : i32
    %c0_i32_0 = arith.constant 0 : i32
    return %arg0, %c0_i32 : i32, i32
  }
}

</mosaic_0001>

<bundles_post_ra>
// kernel: tpu_custom_call.1
= control target key start
LH: loop header
LB: loop body
LE: loop exit
PB: predicated region body
PF: predicated region fallthrough
CT: control target
= control target key end

     0   :  { %20 = vsyncpa [#allocation3], 0  ;;  %s1973_s0 = inlined_call_operand.hbm [shape: bf16[16,128], index: 0, kind: input, shape index: {}]   ;;  %s1974_s1 = inlined_call_operand.hbm [shape: bf16[128,256], index: 1, kind: input, shape index: {}]   ;;  %s1975_s2 = inlined_call_operand.vmem [shape: f32[1,256], index: 2, kind: input, shape index: {}]   ;;  %s1976_s3 = inlined_call_operand.hbm [shape: bf16[256,128], index: 3, kind: input, shape index: {}]   ;;  %s1977_s4 = inlined_call_operand.vmem [shape: f32[1,128], index: 4, kind: input, shape index: {}]   ;;  %s1978_s5 = inlined_call_operand.hbm [shape: bf16[128,128], index: 5, kind: input, shape index: {}]   ;;  %s1979_s6 = inlined_call_operand.vmem [shape: f32[1,128], index: 6, kind: input, shape index: {}]   ;;  %s1980_s7 = inlined_call_operand.hbm [shape: bf16[128,256], index: 7, kind: input, shape index: {}]   ;;  %s1981_s8 = inlined_call_operand.vmem [shape: f32[1,256], index: 8, kind: input, shape index: {}]   ;;  %s1982_s9 = inlined_call_operand.hbm [shape: bf16[128,256], index: 9, kind: input, shape index: {}]   ;;  %s1983_s10 = inlined_call_operand.vmem [shape: f32[1,256], index: 10, kind: input, shape index: {}]   ;;  %s1984_s11 = inlined_call_operand.hbm [shape: bf16[256,128], index: 11, kind: input, shape index: {}]   ;;  %s1985_s12 = inlined_call_operand.vmem [shape: f32[1,128], index: 12, kind: input, shape index: {}]   ;;  %s1986_s13 = inlined_call_operand.hbm [shape: bf16[16,128], index: 13, kind: output, shape index: {0}]   ;;  %s1987_s14 = inlined_call_operand.hbm [shape: bf16[16,128], index: 14, kind: output, shape index: {1}]  }
   0x1   :  { %21 = vsyncpa [#allocation6], 0 }
   0x2   :  { %22 = vsyncpa [#allocation9], 0 }
   0x3   :  { %23 = vsyncpa [#allocation12], 0 }
   0x4   :  { %24 = vsyncpa [#allocation4], 0 }
   0x5   :  { %25 = vsyncpa [#allocation16], 0  ;;  %s1705_s29 = smov [#allocation5]   ;;  %s1495_s17 = scalar_lea.hbm %s1974_s1, 2048 }
   0x6   :  { %s43_s30 = sshll.u32 %s1705_s29, 4  ;;  %p1496_p0 = scmp.ne.s32.totalorder %s1974_s1, %s1495_s17  ;;  %s44_s30 = int_to_ptr.vmem [resolvable:$true] %s43_s30 }
   0x7   :  { %p1499_p1 = scmp.lt.u32.totalorder %s1495_s17, %s1974_s1 }
   0x9   :  { %p1501_p2 = pnand %p1499_p1, %p1496_p0 }
   0xb   :  { %1504 = shalt.err (!%p1501_p2)
}
   0xc   :  { %s1505_s22 = scalar_lea.vmem %s44_s30, 2048  ;;  %p1510_p4 = scmp.lt.s32.totalorder %s44_s30, %s44_s30 }
   0xd   :  { %p1506_p3 = scmp.ne.s32.totalorder %s44_s30, %s1505_s22  ;;  %p1511_p5 = scmp.lt.s32.totalorder %s1505_s22, %s1505_s22 }
   0xf   :  { %p1512_p6 = por %p1511_p5, %p1510_p4 }
  0x11   :  { %p1513_p7 = pnand %p1512_p6, %p1506_p3 }
  0x13   :  { %1516 = shalt.err (!%p1513_p7)
}
  0x14   :  { %s1706_s23 = smov 128   ;;  %s1707_s24 = smov 8  }
  0x15   :  { %49 = dma.hbm_to_vmem [thread:$0]  %s1974_s1, 2048, %s44_s30, [#allocation6], %s1706_s23, %s1706_s23, %s1707_s24  }
  0x16   :  { %s1708_s27 = smov [#allocation8]   ;;  %s1709_s29 = smov [#allocation11]  }
  0x17   :  { %s71_s28 = sshll.u32 %s1708_s27, 4  ;;  %s99_s15 = sshll.u32 %s1709_s29, 4  ;;  %s72_s28 = int_to_ptr.vmem [resolvable:$true] %s71_s28  ;;  %s100_s15 = int_to_ptr.vmem [resolvable:$true] %s99_s15 }
  0x18   :  { %s1517_s18 = scalar_lea.hbm %s1978_s5, 1024 }
  0x19   :  { %p1518_p8 = scmp.ne.s32.totalorder %s1978_s5, %s1517_s18  ;;  %p1521_p9 = scmp.lt.u32.totalorder %s1517_s18, %s1978_s5 }
  0x1b   :  { %p1523_p10 = pnand %p1521_p9, %p1518_p8 }
  0x1d   :  { %1526 = shalt.err (!%p1523_p10)
}
  0x1e   :  { %s1527_s1 = scalar_lea.vmem %s72_s28, 1024  ;;  %p1532_p12 = scmp.lt.s32.totalorder %s72_s28, %s72_s28 }
  0x1f   :  { %p1528_p11 = scmp.ne.s32.totalorder %s72_s28, %s1527_s1  ;;  %p1533_p13 = scmp.lt.s32.totalorder %s1527_s1, %s1527_s1 }
  0x21   :  { %p1534_p0 = por %p1533_p13, %p1532_p12 }
  0x23   :  { %p1535_p1 = pnand %p1534_p0, %p1528_p11 }
  0x25   :  { %1538 = shalt.err (!%p1535_p1)
}
  0x26   :  { %s1710_s30 = smov 64   ;;  %s1711_s25 = smov 4  }
  0x27   :  { %77 = dma.hbm_to_vmem [thread:$0]  %s1978_s5, 1024, %s72_s28, [#allocation9], %s1710_s30, %s1710_s30, %s1711_s25  }
  0x28   :  { %s1539_s17 = scalar_lea.hbm %s1982_s9, 2048 }
  0x29   :  { %p1540_p2 = scmp.ne.s32.totalorder %s1982_s9, %s1539_s17  ;;  %p1543_p3 = scmp.lt.u32.totalorder %s1539_s17, %s1982_s9 }
  0x2b   :  { %p1545_p4 = pnand %p1543_p3, %p1540_p2 }
  0x2d   :  { %1548 = shalt.err (!%p1545_p4)
}
  0x2e   :  { %s1549_s22 = scalar_lea.vmem %s100_s15, 2048  ;;  %p1554_p6 = scmp.lt.s32.totalorder %s100_s15, %s100_s15 }
  0x2f   :  { %p1550_p5 = scmp.ne.s32.totalorder %s100_s15, %s1549_s22  ;;  %p1555_p7 = scmp.lt.s32.totalorder %s1549_s22, %s1549_s22 }
  0x31   :  { %p1556_p8 = por %p1555_p7, %p1554_p6 }
  0x33   :  { %p1557_p9 = pnand %p1556_p8, %p1550_p5 }
  0x35   :  { %1560 = shalt.err (!%p1557_p9)
}
  0x36   :  { %105 = dma.hbm_to_vmem [thread:$0]  %s1982_s9, 2048, %s100_s15, [#allocation12], %s1706_s23, %s1706_s23, %s1707_s24  }
  0x37   :  { %s1712_s1 = smov [#allocation2]   ;;  %s1713_s27 = smov [#allocation7]  }
  0x38   :  { %s31_s26 = sshll.u32 %s1712_s1, 4  ;;  %s57_s29 = sshll.u32 %s1713_s27, 4  ;;  %s32_s26 = int_to_ptr.vmem [resolvable:$true] %s31_s26  ;;  %s58_s29 = int_to_ptr.vmem [resolvable:$true] %s57_s29 }
  0x39   :  { %s1561_s18 = scalar_lea.hbm %s1973_s0, 128 }
  0x3a   :  { %p1562_p10 = scmp.ne.s32.totalorder %s1973_s0, %s1561_s18  ;;  %p1565_p11 = scmp.lt.u32.totalorder %s1561_s18, %s1973_s0 }
  0x3c   :  { %p1567_p12 = pnand %p1565_p11, %p1562_p10 }
  0x3e   :  { %1570 = shalt.err (!%p1567_p12)
}
  0x3f   :  { %s1571_s9 = scalar_lea.vmem %s32_s26, 128  ;;  %p1576_p0 = scmp.lt.s32.totalorder %s32_s26, %s32_s26 }
  0x40   :  { %p1572_p13 = scmp.ne.s32.totalorder %s32_s26, %s1571_s9  ;;  %p1577_p1 = scmp.lt.s32.totalorder %s1571_s9, %s1571_s9 }
  0x42   :  { %p1578_p2 = por %p1577_p1, %p1576_p0 }
  0x44   :  { %p1579_p3 = pnand %p1578_p2, %p1572_p13 }
  0x46   :  { %1582 = shalt.err (!%p1579_p3)
}
  0x47   :  { %37 = dma.hbm_to_vmem [thread:$0]  %s1973_s0, 128, %s32_s26, [#allocation3], %s1710_s30, %s1710_s30, %s1711_s25  }
  0x48   :  { %s1583_s27 = scalar_lea.hbm %s1976_s3, 2048 }
  0x49   :  { %p1584_p4 = scmp.ne.s32.totalorder %s1976_s3, %s1583_s27  ;;  %p1587_p5 = scmp.lt.u32.totalorder %s1583_s27, %s1976_s3 }
  0x4b   :  { %p1589_p6 = pnand %p1587_p5, %p1584_p4 }
  0x4d   :  { %1592 = shalt.err (!%p1589_p6)
}
  0x4e   :  { %s1593_s20 = scalar_lea.vmem %s58_s29, 2048  ;;  %p1598_p8 = scmp.lt.s32.totalorder %s58_s29, %s58_s29 }
  0x4f   :  { %p1594_p7 = scmp.ne.s32.totalorder %s58_s29, %s1593_s20  ;;  %p1599_p9 = scmp.lt.s32.totalorder %s1593_s20, %s1593_s20 }
  0x51   :  { %p1600_p10 = por %p1599_p9, %p1598_p8 }
  0x53   :  { %p1601_p11 = pnand %p1600_p10, %p1594_p7 }
  0x55   :  { %1604 = shalt.err (!%p1601_p11)
}
  0x56   :  { %63 = dma.hbm_to_vmem [thread:$0]  %s1976_s3, 2048, %s58_s29, [#allocation6], %s1710_s30, %s1710_s30, %s1711_s25  }
  0x57   :  { %s1714_s21 = smov [#allocation10]   ;;  %s1715_s9 = smov [#allocation13]  }
  0x58   :  { %s85_s22 = sshll.u32 %s1714_s21, 4  ;;  %s113_s15 = sshll.u32 %s1715_s9, 4  ;;  %s86_s22 = int_to_ptr.vmem [resolvable:$true] %s85_s22  ;;  %s114_s15 = int_to_ptr.vmem [resolvable:$true] %s113_s15 }
  0x59   :  { %s1605_s1 = scalar_lea.hbm %s1980_s7, 2048 }
  0x5a   :  { %p1606_p12 = scmp.ne.s32.totalorder %s1980_s7, %s1605_s1  ;;  %p1609_p13 = scmp.lt.u32.totalorder %s1605_s1, %s1980_s7 }
  0x5c   :  { %p1611_p0 = pnand %p1609_p13, %p1606_p12 }
  0x5e   :  { %1614 = shalt.err (!%p1611_p0)
}
  0x5f   :  { %s1615_s3 = scalar_lea.vmem %s86_s22, 2048  ;;  %p1620_p2 = scmp.lt.s32.totalorder %s86_s22, %s86_s22 }
  0x60   :  { %p1616_p1 = scmp.ne.s32.totalorder %s86_s22, %s1615_s3  ;;  %p1621_p3 = scmp.lt.s32.totalorder %s1615_s3, %s1615_s3 }
  0x62   :  { %p1622_p4 = por %p1621_p3, %p1620_p2 }
  0x64   :  { %p1623_p5 = pnand %p1622_p4, %p1616_p1 }
  0x66   :  { %1626 = shalt.err (!%p1623_p5)
}
  0x67   :  { %91 = dma.hbm_to_vmem [thread:$0]  %s1980_s7, 2048, %s86_s22, [#allocation9], %s1706_s23, %s1706_s23, %s1707_s24  }
  0x68   :  { %s1627_s26 = scalar_lea.hbm %s1984_s11, 2048 }
  0x69   :  { %p1628_p6 = scmp.ne.s32.totalorder %s1984_s11, %s1627_s26  ;;  %p1631_p7 = scmp.lt.u32.totalorder %s1627_s26, %s1984_s11 }
  0x6b   :  { %p1633_p8 = pnand %p1631_p7, %p1628_p6 }
  0x6d   :  { %1636 = shalt.err (!%p1633_p8)
}
  0x6e   :  { %s1637_s1 = scalar_lea.vmem %s114_s15, 2048  ;;  %p1642_p10 = scmp.lt.s32.totalorder %s114_s15, %s114_s15 }
  0x6f   :  { %p1638_p9 = scmp.ne.s32.totalorder %s114_s15, %s1637_s1  ;;  %p1643_p11 = scmp.lt.s32.totalorder %s1637_s1, %s1637_s1 }
  0x71   :  { %p1644_p12 = por %p1643_p11, %p1642_p10 }
  0x73   :  { %p1645_p13 = pnand %p1644_p12, %p1638_p9 }
  0x75   :  { %1648 = shalt.err (!%p1645_p13)
}
  0x76   :  { %119 = dma.hbm_to_vmem [thread:$0]  %s1984_s11, 2048, %s114_s15, [#allocation12], %s1710_s30, %s1710_s30, %s1711_s25  }
  0x77   :  { %1693 = dma.done.wait [#allocation3], 128  }
  0x78   :  { %1694 = vsyncadd [#allocation3], 4294967168 }
  0x79   :  { %1695 = dma.done.wait [#allocation6], 4096  }
  0x7a   :  { %1696 = vsyncadd [#allocation6], 4294963200 }
  0x7b   :  { %1697 = dma.done.wait [#allocation9], 3072  }
  0x7c   :  { %1698 = vsyncadd [#allocation9], 4294964224 }
  0x7d   :  { %1699 = dma.done.wait [#allocation12], 4096  }
  0x7e   :  { %1700 = vsyncadd [#allocation12], 4294963200  ;;  %v1716_v0 = vmov 0   ;;  %v1374_v1 = vld [vmem:[#allocation5 + $0x4] ss:$8 sps:$4 sm:$0xff]   ;;  %v1403_v16 = vld [vmem:[#allocation7 + $0x50] sm:$0xff]   ;;  %v164_v40 = vlaneseq }
  0x7f   :  { %292 = vmatprep.mubr.bf16.mxu0 %v1716_v0  ;;  %1368 = vset.pattern.permute.xlu0 %v1716_v0  ;;  %v1376_v2 = vld [vmem:[#allocation5] ss:$8 sps:$4 sm:$0xff]   ;;  %v1377_v3 = vld [vmem:[#allocation5 + $0x14] ss:$8 sps:$4 sm:$0xff]   ;;  %v1379_v4 = vld [vmem:[#allocation5 + $0x10] ss:$8 sps:$4 sm:$0xff]  }
  0x80   :  { %260 = vmatprep.subr.bf16.mxu0 %v1374_v1  ;;  %v1380_v5 = vld [vmem:[#allocation5 + $0x24] ss:$8 sps:$4 sm:$0xff]   ;;  %v1382_v6 = vld [vmem:[#allocation5 + $0x20] ss:$8 sps:$4 sm:$0xff]   ;;  %v1383_v7 = vld [vmem:[#allocation5 + $0x34] ss:$8 sps:$4 sm:$0xff]  }
  0x81   :  { %261 = vmatpush1.bf16.msra.mxu0 %v1376_v2  ;;  %v1385_v8 = vld [vmem:[#allocation5 + $0x30] ss:$8 sps:$4 sm:$0xff]   ;;  %v1386_v9 = vld [vmem:[#allocation5 + $0x44] ss:$8 sps:$4 sm:$0xff]   ;;  %v1388_v11 = vld [vmem:[#allocation5 + $0x40] ss:$8 sps:$4 sm:$0xff]  }
  0x82   :  { %262 = vmatprep.subr.bf16.mxu0 %v1377_v3  ;;  %v1399_v10 = vld [vmem:[#allocation7 + $0x40] sm:$0xff]   ;;  %v1389_v13 = vld [vmem:[#allocation5 + $0x54] ss:$8 sps:$4 sm:$0xff]   ;;  %v1401_v14 = vld [vmem:[#allocation7 + $0x48] sm:$0xff]   ;;  %v1717_v35 = vmov 0.0   ;;  %v165_v41 = vshrl.u32 %v164_v40, 7 }
  0x83   :  { %v1400_v12 = vld [vmem:[#allocation7] sm:$0xff]   ;;  %1279 = vmatprep.subr.bf16.mxu1 %v1399_v10  ;;  %v1402_v15 = vld [vmem:[#allocation7 + $0x8] sm:$0xff]   ;;  %v1391_v17 = vld [vmem:[#allocation5 + $0x50] ss:$8 sps:$4 sm:$0xff]   ;;  %vm1718_vm0 = vmmov 0  }
  0x84   :  { %1280 = vmatpush3.bf16.msra.mxu1 %v1400_v12  ;;  %v1392_v18 = vld [vmem:[#allocation5 + $0x64] ss:$8 sps:$4 sm:$0xff]   ;;  %v1404_v19 = vld [vmem:[#allocation7 + $0x10] sm:$0xff]   ;;  %v1405_v20 = vld [vmem:[#allocation7 + $0x58] sm:$0xff]   ;;  %v1904_v42 = vsub.s32 0, %v165_v41  ;;  %v1909_v44 = vsub.s32 1, %v165_v41 }
  0x85   :  { %263 = vmatpush1.bf16.msra.mxu0 %v1379_v4  ;;  %1281 = vmatprep.subr.bf16.mxu1 %v1401_v14  ;;  %v1394_v21 = vld [vmem:[#allocation5 + $0x60] ss:$8 sps:$4 sm:$0xff]   ;;  %v1395_v22 = vld [vmem:[#allocation5 + $0x74] ss:$8 sps:$4 sm:$0xff]   ;;  %v1397_v25 = vld [vmem:[#allocation5 + $0x70] ss:$8 sps:$4 sm:$0xff]  }
  0x86   :  { %264 = vmatprep.subr.bf16.mxu0 %v1380_v5  ;;  %v1406_v23 = vld [vmem:[#allocation7 + $0x18] sm:$0xff]   ;;  %v1407_v24 = vld [vmem:[#allocation7 + $0x60] sm:$0xff]   ;;  %v1409_v27 = vld [vmem:[#allocation7 + $0x68] sm:$0xff]  }
  0x87   :  { %v1408_v26 = vld [vmem:[#allocation7 + $0x20] sm:$0xff]   ;;  %v1398_v28 = vld [vmem:[#allocation2] sm:$0xff]   ;;  %v1410_v29 = vld [vmem:[#allocation7 + $0x28] sm:$0xff]  }
  0x88   :  { %1282 = vmatpush3.bf16.msra.mxu1 %v1402_v15  ;;  %v1411_v30 = vld [vmem:[#allocation7 + $0x70] sm:$0xff]   ;;  %v1413_v32 = vld [vmem:[#allocation7 + $0x78] sm:$0xff]   ;;  %v1415_v34 = vld [vmem:[#allocation8] sm:$0xff]  }
  0x89   :  { %265 = vmatpush1.bf16.msra.mxu0 %v1382_v6  ;;  %1283 = vmatprep.subr.bf16.mxu1 %v1403_v16  ;;  %v1412_v31 = vld [vmem:[#allocation7 + $0x30] sm:$0xff]   ;;  %v1414_v33 = vld [vmem:[#allocation7 + $0x38] sm:$0xff]   ;;  %v1416_v36 = vld [vmem:[#allocation8 + $0x8] sm:$0xff]  }
  0x8a   :  { %266 = vmatprep.subr.bf16.mxu0 %v1383_v7  ;;  %v1417_v37 = vld [vmem:[#allocation8 + $0x10] sm:$0xff]   ;;  %v1418_v38 = vld [vmem:[#allocation8 + $0x18] sm:$0xff]   ;;  %v1419_v39 = vld [vmem:[#allocation8 + $0x20] sm:$0xff]  }
  0x8b   :  { %v162_v43 = vld [vmem:[%s1975_s2] sm:$0x3]  ;;  %v1420_v61 = vld [vmem:[#allocation8 + $0x28] sm:$0xff]   ;;  %v1421_v62 = vld [vmem:[#allocation8 + $0x30] sm:$0xff]  }
  0x8c   :  { %1284 = vmatpush3.bf16.msra.mxu1 %v1404_v19  ;;  %v167_v45 = vrot.slane %v162_v43, %v1904_v42  ;;  %v171_v46 = vrot.slane %v162_v43, %v1909_v44  ;;  %v1422_v63 = vld [vmem:[#allocation8 + $0x38] sm:$0xff]   ;;  %v1423_v1 = vld [vmem:[#allocation10] ss:$8 sps:$4 sm:$0xff]   ;;  %v1425_v2 = vld [vmem:[#allocation10 + $0x4] ss:$8 sps:$4 sm:$0xff]  }
  0x8d   :  { %267 = vmatpush1.bf16.msra.mxu0 %v1385_v8  ;;  %1285 = vmatprep.subr.bf16.mxu1 %v1405_v20  ;;  %v1428_v3 = vld [vmem:[#allocation10 + $0x14] ss:$8 sps:$4 sm:$0xff]   ;;  %v1426_v4 = vld [vmem:[#allocation10 + $0x10] ss:$8 sps:$4 sm:$0xff]   ;;  %v1431_v5 = vld [vmem:[#allocation10 + $0x24] ss:$8 sps:$4 sm:$0xff]  }
  0x8e   :  { %268 = vmatprep.subr.bf16.mxu0 %v1386_v9  ;;  %v1429_v6 = vld [vmem:[#allocation10 + $0x20] ss:$8 sps:$4 sm:$0xff]   ;;  %v1434_v7 = vld [vmem:[#allocation10 + $0x34] ss:$8 sps:$4 sm:$0xff]   ;;  %v1432_v8 = vld [vmem:[#allocation10 + $0x30] ss:$8 sps:$4 sm:$0xff]  }
  0x8f   :  { %v1437_v9 = vld [vmem:[#allocation10 + $0x44] ss:$8 sps:$4 sm:$0xff]   ;;  %v1435_v10 = vld [vmem:[#allocation10 + $0x40] ss:$8 sps:$4 sm:$0xff]   ;;  %v1438_v12 = vld [vmem:[#allocation10 + $0x50] ss:$8 sps:$4 sm:$0xff]  }
  0x90   :  { %1286 = vmatpush3.bf16.msra.mxu1 %v1406_v23  ;;  %v1441_v14 = vld [vmem:[#allocation10 + $0x60] ss:$8 sps:$4 sm:$0xff]   ;;  %v1186_v16 = vld [vmem:[%s1977_s4] ss:$0 sm:$0xff] }
  0x91   :  { %269 = vmatpush1.bf16.msra.mxu0 %v1388_v11  ;;  %1287 = vmatprep.subr.bf16.mxu1 %v1407_v24  ;;  %v1440_v11 = vld [vmem:[#allocation10 + $0x54] ss:$8 sps:$4 sm:$0xff]   ;;  %v1203_v41 = vld [vmem:[%s1979_s6] ss:$0 sm:$0xff] }
  0x92   :  { %270 = vmatprep.subr.bf16.mxu0 %v1389_v13  ;;  %v1443_v13 = vld [vmem:[#allocation10 + $0x64] ss:$8 sps:$4 sm:$0xff]  }
  0x94   :  { %1288 = vmatpush3.bf16.msra.mxu1 %v1408_v26 }
  0x95   :  { %271 = vmatpush1.bf16.msra.mxu0 %v1391_v17  ;;  %1289 = vmatprep.subr.bf16.mxu1 %v1409_v27  ;;  %v1446_v27 = vld [vmem:[#allocation10 + $0x74] ss:$8 sps:$4 sm:$0xff]  }
  0x96   :  { %272 = vmatprep.subr.bf16.mxu0 %v1392_v18 }
  0x98   :  { %1290 = vmatpush3.bf16.msra.mxu1 %v1410_v29  ;;  %v1447_v29 = vld [vmem:[#allocation11] ss:$8 sps:$4 sm:$0xff]  }
  0x99   :  { %273 = vmatpush1.bf16.msra.mxu0 %v1394_v21  ;;  %1291 = vmatprep.subr.bf16.mxu1 %v1411_v30  ;;  %v1449_v30 = vld [vmem:[#allocation11 + $0x4] ss:$8 sps:$4 sm:$0xff]  }
  0x9a   :  { %274 = vmatprep.subr.bf16.mxu0 %v1395_v22 }
  0x9c   :  { %1292 = vmatpush3.bf16.msra.mxu1 %v1412_v31  ;;  %v1452_v31 = vld [vmem:[#allocation11 + $0x14] ss:$8 sps:$4 sm:$0xff]  }
  0x9d   :  { %275 = vmatpush1.bf16.msra.mxu0 %v1397_v25  ;;  %1293 = vmatprep.subr.bf16.mxu1 %v1413_v32  ;;  %v1450_v32 = vld [vmem:[#allocation11 + $0x10] ss:$8 sps:$4 sm:$0xff]  }
  0x9e   :  { %1332 = vmatprep.subr.bf16.mxu0 %v1717_v35 }
  0xa0   :  { %293 = vmatmul.mubr.bf16.vlgmr.msra.gmra.mrb[0].mxu0 %v1398_v28  ;;  %1294 = vmatpush3.bf16.msra.mxu1 %v1414_v33  ;;  %v1444_v28 = vld [vmem:[#allocation10 + $0x70] ss:$8 sps:$4 sm:$0xff]   ;;  %v1455_v33 = vld [vmem:[#allocation11 + $0x24] ss:$8 sps:$4 sm:$0xff]  }
  0xa1   :  { %1333 = vmatpush3.bf16.msra.mxu0 %v1415_v34  ;;  %1348 = vmatprep.mubr.msk.bf16.mxu0 %vm1718_vm0, %v1717_v35  ;;  %v1453_v34 = vld [vmem:[#allocation11 + $0x20] ss:$8 sps:$4 sm:$0xff]  }
  0xa2   :  { %1334 = vmatprep.subr.bf16.mxu0 %v1717_v35  ;;  %709 = vmatprep.subr.bf16.mxu1 %v1425_v2 }
  0xa5   :  { %1335 = vmatpush3.bf16.msra.mxu0 %v1416_v36  ;;  %v1456_v36 = vld [vmem:[#allocation11 + $0x30] ss:$8 sps:$4 sm:$0xff]  }
  0xa6   :  { %1336 = vmatprep.subr.bf16.mxu0 %v1717_v35 }
  0xa9   :  { %1337 = vmatpush3.bf16.msra.mxu0 %v1417_v37  ;;  %v1459_v37 = vld [vmem:[#allocation11 + $0x40] ss:$8 sps:$4 sm:$0xff]  }
  0xaa   :  { %1338 = vmatprep.subr.bf16.mxu0 %v1717_v35 }
  0xad   :  { %1339 = vmatpush3.bf16.msra.mxu0 %v1418_v38  ;;  %v1464_v38 = vld [vmem:[#allocation11 + $0x54] ss:$8 sps:$4 sm:$0xff]  }
  0xae   :  { %1340 = vmatprep.subr.bf16.mxu0 %v1717_v35 }
  0xb1   :  { %1341 = vmatpush3.bf16.msra.mxu0 %v1419_v39  ;;  %v1462_v39 = vld [vmem:[#allocation11 + $0x50] ss:$8 sps:$4 sm:$0xff]  }
  0xb2   :  { %1342 = vmatprep.subr.bf16.mxu0 %v1717_v35 }
  0xb5   :  { %1343 = vmatpush3.bf16.msra.mxu0 %v1420_v61 }
  0xb6   :  { %1344 = vmatprep.subr.bf16.mxu0 %v1717_v35 }
  0xb9   :  { %1345 = vmatpush3.bf16.msra.mxu0 %v1421_v62 }
  0xba   :  { %1346 = vmatprep.subr.bf16.mxu0 %v1717_v35  ;;  %v1458_v35 = vld [vmem:[#allocation11 + $0x34] ss:$8 sps:$4 sm:$0xff]  }
  0xbd   :  { %1347 = vmatpush3.bf16.msra.mxu0 %v1422_v63 }
  0xbe   :  { %873 = vmatprep.subr.bf16.mxu0 %v1449_v30  ;;  %v1484_v30 = vld [vmem:[#allocation13 + $0x30] sm:$0xff]  }
 0x173   :  { %v294_v47 = vpop.f32.mrb[0].mxu0 }
 0x174   :  { %v295_v48 = vadd.f32 %v294_v47, %v167_v45  ;;  %v296_v49 = vpop.f32.mrb[1].mxu0 }
 0x175   :  { %v297_v50 = vadd.f32 %v296_v49, %v171_v46  ;;  %v298_v51 = vpop.f32.mrb[2].mxu0 }
 0x176   :  { %v299_v52 = vadd.f32 %v298_v51, %v167_v45  ;;  %v300_v53 = vpop.f32.mrb[3].mxu0  ;;  %v303_v55 = vmax.f32 %v295_v48, 0.0  ;;  %v1467_v51 = vld [vmem:[#allocation11 + $0x64] ss:$8 sps:$4 sm:$0xff]  }
 0x177   :  { %v301_v54 = vadd.f32 %v300_v53, %v171_v46  ;;  %v304_v57 = vmax.f32 %v297_v50, 0.0  ;;  %v1470_v53 = vld [vmem:[#allocation11 + $0x74] ss:$8 sps:$4 sm:$0xff]  }
 0x178   :  { %v305_v56 = vmax.f32 %v299_v52, 0.0  ;;  %v1465_v52 = vld [vmem:[#allocation11 + $0x60] ss:$8 sps:$4 sm:$0xff]  }
 0x179   :  { %v306_v58 = vmax.f32 %v301_v54, 0.0  ;;  %v1468_v54 = vld [vmem:[#allocation11 + $0x70] ss:$8 sps:$4 sm:$0xff]  }
 0x17a   :  { %v307_v59 = vpack.c.bf16 %v305_v56, %v303_v55  ;;  %v617_v55 = vld [vmem:[%s1981_s8] sm:$0x3] }
 0x17b   :  { %v308_v60 = vpack.c.bf16 %v306_v58, %v304_v57  ;;  %v622_v56 = vrot.slane %v617_v55, %v1904_v42  ;;  %v626_v57 = vrot.slane %v617_v55, %v1909_v44 }
 0x17d   :  { %476 = vmatprep.mubr.bf16.mxu1 %v308_v60 }
 0x17e   :  { %477 = vmatmul.mubr.bf16.vlgmr.msra.gmra.mrb[0].mxu1 %v307_v59 }
 0x17f   :  { %741 = vmatprep.mubr.bf16.mxu1 %v1716_v0  ;;  %710 = vmatpush1.bf16.msra.mxu1 %v1423_v1 }
 0x180   :  { %711 = vmatprep.subr.bf16.mxu1 %v1428_v3 }
 0x183   :  { %712 = vmatpush1.bf16.msra.mxu1 %v1426_v4 }
 0x184   :  { %713 = vmatprep.subr.bf16.mxu1 %v1431_v5 }
 0x187   :  { %714 = vmatpush1.bf16.msra.mxu1 %v1429_v6 }
 0x188   :  { %715 = vmatprep.subr.bf16.mxu1 %v1434_v7 }
 0x18b   :  { %716 = vmatpush1.bf16.msra.mxu1 %v1432_v8 }
 0x18c   :  { %717 = vmatprep.subr.bf16.mxu1 %v1437_v9 }
 0x18f   :  { %718 = vmatpush1.bf16.msra.mxu1 %v1435_v10 }
 0x190   :  { %719 = vmatprep.subr.bf16.mxu1 %v1440_v11 }
 0x193   :  { %720 = vmatpush1.bf16.msra.mxu1 %v1438_v12 }
 0x194   :  { %721 = vmatprep.subr.bf16.mxu1 %v1443_v13 }
 0x197   :  { %722 = vmatpush1.bf16.msra.mxu1 %v1441_v14 }
 0x198   :  { %723 = vmatprep.subr.bf16.mxu1 %v1446_v27  ;;  %v1481_v27 = vld [vmem:[#allocation13 + $0x68] sm:$0xff]  }
 0x19b   :  { %724 = vmatpush1.bf16.msra.mxu1 %v1444_v28  ;;  %v1482_v28 = vld [vmem:[#allocation13 + $0x28] sm:$0xff]  }
 0x251   :  { %v1295_v15 = vpop.f32.mrb[0].mxu1 }
 0x252   :  { %v1296_v17 = vpop.f32.mrb[1].mxu1 }
 0x253   :  { %v1297_v18 = vadd.f32 %v1296_v17, %v1295_v15  ;;  %v1298_v19 = vpop.f32.mrb[2].mxu1  ;;  %v1471_v17 = vld [vmem:[#allocation13 + $0x40] sm:$0xff]  }
 0x254   :  { %v1299_v20 = vpop.f32.mrb[3].mxu1  ;;  %1310 = vmatprep.subr.bf16.mxu1 %v1471_v17 }
 0x255   :  { %v479_v21 = vadd.f32 %v1297_v18, %v1186_v16  ;;  %v1300_v22 = vadd.f32 %v1299_v20, %v1298_v19  ;;  %v1472_v18 = vld [vmem:[#allocation13] sm:$0xff]   ;;  %v1473_v19 = vld [vmem:[#allocation13 + $0x48] sm:$0xff]  }
 0x256   :  { %v1474_v20 = vld [vmem:[#allocation13 + $0x8] sm:$0xff]  }
 0x257   :  { %v482_v23 = vadd.f32 %v1300_v22, %v1186_v16  ;;  %v485_v24 = vmax.f32 %v479_v21, 0.0  ;;  %v1475_v21 = vld [vmem:[#allocation13 + $0x50] sm:$0xff]  }
 0x258   :  { %v1476_v22 = vld [vmem:[#allocation13 + $0x10] sm:$0xff]  }
 0x259   :  { %v486_v25 = vmax.f32 %v482_v23, 0.0  ;;  %v1477_v23 = vld [vmem:[#allocation13 + $0x58] sm:$0xff]  }
 0x25b   :  { %v487_v26 = vpack.c.bf16 %v486_v25, %v485_v24  ;;  %v1478_v24 = vld [vmem:[#allocation13 + $0x18] sm:$0xff]   ;;  %v1479_v25 = vld [vmem:[#allocation13 + $0x60] sm:$0xff]  }
 0x25d   :  { %1349 = vmatmul.mubr.bf16.vlgmr.msra.gmra.mrb[4].mxu0 %v487_v26  ;;  %v1480_v26 = vld [vmem:[#allocation13 + $0x20] sm:$0xff]  }
 0x25e   :  { %905 = vmatprep.mubr.bf16.mxu0 %v1716_v0  ;;  %874 = vmatpush1.bf16.msra.mxu0 %v1447_v29  ;;  %v1461_v0 = vld [vmem:[#allocation11 + $0x44] ss:$8 sps:$4 sm:$0xff]   ;;  %v1483_v29 = vld [vmem:[#allocation13 + $0x70] sm:$0xff]  }
 0x25f   :  { %875 = vmatprep.subr.bf16.mxu0 %v1452_v31  ;;  %v1485_v31 = vld [vmem:[#allocation13 + $0x78] sm:$0xff]  }
 0x262   :  { %876 = vmatpush1.bf16.msra.mxu0 %v1450_v32  ;;  %v1486_v32 = vld [vmem:[#allocation13 + $0x38] sm:$0xff]  }
 0x263   :  { %877 = vmatprep.subr.bf16.mxu0 %v1455_v33  ;;  %v1109_v33 = vand.u32 127, %v164_v40 }
 0x265   :  { %vm1110_vm1 = vcmp.eq.s32.totalorder %v1109_v33, 16 }
 0x266   :  { %878 = vmatpush1.bf16.msra.mxu0 %v1453_v34 }
 0x267   :  { %879 = vmatprep.subr.bf16.mxu0 %v1458_v35 }
 0x26a   :  { %880 = vmatpush1.bf16.msra.mxu0 %v1456_v36 }
 0x26b   :  { %881 = vmatprep.subr.bf16.mxu0 %v1461_v0 }
 0x26e   :  { %882 = vmatpush1.bf16.msra.mxu0 %v1459_v37 }
 0x26f   :  { %883 = vmatprep.subr.bf16.mxu0 %v1464_v38 }
 0x272   :  { %884 = vmatpush1.bf16.msra.mxu0 %v1462_v39  ;;  %v781_v39 = vld [vmem:[%s1983_s10] sm:$0x3]  ;;  %s1719_s10 = smov [#allocation14]  }
 0x273   :  { %885 = vmatprep.subr.bf16.mxu0 %v1467_v51  ;;  %s1138_s17 = sshll.u32 %s1719_s10, 4  ;;  %s1139_s17 = int_to_ptr.vmem [resolvable:$true] %s1138_s17 }
 0x274   :  { %s1649_s18 = scalar_lea.vmem %s1139_s17, 128  ;;  %p1654_p1 = scmp.lt.s32.totalorder %s1139_s17, %s1139_s17 }
 0x275   :  { %p1650_p0 = scmp.ne.s32.totalorder %s1139_s17, %s1649_s18  ;;  %p1655_p2 = scmp.lt.s32.totalorder %s1649_s18, %s1649_s18 }
 0x276   :  { %886 = vmatpush1.bf16.msra.mxu0 %v1465_v52 }
 0x277   :  { %887 = vmatprep.subr.bf16.mxu0 %v1470_v53  ;;  %p1656_p3 = por %p1655_p2, %p1654_p1 }
 0x279   :  { %p1657_p4 = pnand %p1656_p3, %p1650_p0 }
 0x27a   :  { %888 = vmatpush1.bf16.msra.mxu0 %v1468_v54 }
 0x330   :  { %v593_v43 = vpop.f32.mrb[4].mxu0 }
 0x331   :  { %v1350_v45 = vpop.f32.mrb[5].mxu0  ;;  %v1921_v47 = vadd.f32 %v1203_v41, %v593_v43  ;;  %v790_v43 = vrot.slane %v781_v39, %v1909_v44 }
 0x332   :  { %v596_v46 = vpop.f32.mrb[6].mxu0 }
 0x333   :  { %v1923_v48 = vadd.f32 %v1203_v41, %v596_v46  ;;  %v1351_v49 = vpop.f32.mrb[7].mxu0  ;;  %v786_v41 = vrot.slane %v781_v39, %v1904_v42 }
 0x335   :  { %v600_v50 = vpack.c.bf16 %v1923_v48, %v1921_v47 }
 0x337   :  { %742 = vmatmul.mubr.bf16.vlgmr.msra.gmra.mrb[4].mxu1 %v600_v50 }
 0x338   :  { %1311 = vmatpush3.bf16.msra.mxu1 %v1472_v18 }
 0x339   :  { %1312 = vmatprep.subr.bf16.mxu1 %v1473_v19 }
 0x33c   :  { %1313 = vmatpush3.bf16.msra.mxu1 %v1474_v20 }
 0x33d   :  { %1314 = vmatprep.subr.bf16.mxu1 %v1475_v21 }
 0x340   :  { %1315 = vmatpush3.bf16.msra.mxu1 %v1476_v22 }
 0x341   :  { %1316 = vmatprep.subr.bf16.mxu1 %v1477_v23 }
 0x344   :  { %1317 = vmatpush3.bf16.msra.mxu1 %v1478_v24 }
 0x345   :  { %1318 = vmatprep.subr.bf16.mxu1 %v1479_v25 }
 0x348   :  { %1319 = vmatpush3.bf16.msra.mxu1 %v1480_v26 }
 0x349   :  { %1320 = vmatprep.subr.bf16.mxu1 %v1481_v27 }
 0x34c   :  { %1321 = vmatpush3.bf16.msra.mxu1 %v1482_v28 }
 0x34d   :  { %1322 = vmatprep.subr.bf16.mxu1 %v1483_v29 }
 0x350   :  { %1323 = vmatpush3.bf16.msra.mxu1 %v1484_v30 }
 0x351   :  { %1324 = vmatprep.subr.bf16.mxu1 %v1485_v31 }
 0x354   :  { %1325 = vmatpush3.bf16.msra.mxu1 %v1486_v32 }
 0x40a   :  { %v743_v58 = vpop.f32.mrb[4].mxu1 }
 0x40b   :  { %v744_v59 = vadd.f32 %v743_v58, %v622_v56  ;;  %v745_v60 = vpop.f32.mrb[5].mxu1 }
 0x40c   :  { %v746_v61 = vadd.f32 %v745_v60, %v626_v57  ;;  %v747_v62 = vpop.f32.mrb[6].mxu1 }
 0x40d   :  { %v748_v63 = vadd.f32 %v747_v62, %v622_v56  ;;  %v749_v1 = vpop.f32.mrb[7].mxu1  ;;  %v752_v4 = vmax.f32 %v744_v59, 0.0 }
 0x40e   :  { %v755_v2 = vsub.f32 0.0, %v746_v61  ;;  %v750_v3 = vadd.f32 %v749_v1, %v626_v57 }
 0x40f   :  { %v753_v5 = vmax.f32 %v748_v63, 0.0 }
 0x410   :  { %v757_v6 = vmul.f32 1.442695, %v755_v2  ;;  %v756_v7 = vsub.f32 0.0, %v750_v3 }
 0x411   :  { %v754_v8 = vpack.c.bf16 %v753_v5, %v752_v4 }
 0x412   :  { %1487 = vpow2.f32 %v757_v6  ;;  %v759_v9 = vmul.f32 1.442695, %v756_v7 }
 0x413   :  { %906 = vmatmul.mubr.bf16.vlgmr.msra.gmra.mrb[8].mxu0 %v754_v8 }
 0x414   :  { %1489 = vpow2.f32 %v759_v9 }
 0x41c   :  { %v1488_v10 = vpop.eup %1487 }
 0x41d   :  { %v761_v11 = vadd.f32 1.0, %v1488_v10 }
 0x41e   :  { %v1490_v12 = vpop.eup %1489 }
 0x41f   :  { %v762_v13 = vadd.f32 1.0, %v1490_v12  ;;  %1491 = vrcp.f32 %v761_v11 }
 0x421   :  { %1493 = vrcp.f32 %v762_v13 }
 0x429   :  { %v1492_v14 = vpop.eup %1491 }
 0x42b   :  { %v1494_v15 = vpop.eup %1493 }
 0x42c   :  { %v1369_v16 = vpack.i.bf16 %v1494_v15, %v1492_v14 }
 0x42e   :  { %1370 = vperm.xlu0 %1368, %v1369_v16  }
 0x4ad   :  { %v1371_v34 = vpop.permute.xlu0 %1370 }
 0x4ae   :  { %v1373_v35 = vunpack.i.h.bf16 %v1371_v34  ;;  %v1372_v36 = vunpack.i.l.bf16 %v1371_v34 }
 0x4b0   :  { %v1121_v0 = vsel %vm1110_vm1, %v1372_v36, %v1921_v47  ;;  %v1122_v37 = vsel %vm1110_vm1, %v1373_v35, %v1923_v48 }
 0x4b1   :  { %v1277_v38 = vpack.c.bf16 %v1122_v37, %v1121_v0 }
 0x4b3   :  { %1278 = vst [vmem:[#allocation14] sm:$0xff] %v1277_v38  }
 0x4e6   :  { %v907_v45 = vpop.f32.mrb[8].mxu0 }
 0x4e7   :  { %v908_v40 = vadd.f32 %v907_v45, %v786_v41  ;;  %v909_v46 = vpop.f32.mrb[9].mxu0 }
 0x4e8   :  { %v910_v49 = vadd.f32 %v909_v46, %v790_v43  ;;  %v911_v50 = vpop.f32.mrb[10].mxu0 }
 0x4e9   :  { %v912_v51 = vadd.f32 %v911_v50, %v786_v41  ;;  %v913_v52 = vpop.f32.mrb[11].mxu0  ;;  %v916_v53 = vmax.f32 %v908_v40, 0.0 }
 0x4ea   :  { %v914_v47 = vadd.f32 %v913_v52, %v790_v43  ;;  %v917_v54 = vmax.f32 %v910_v49, 0.0 }
 0x4eb   :  { %v918_v48 = vmax.f32 %v912_v51, 0.0 }
 0x4ec   :  { %v919_v55 = vmax.f32 %v914_v47, 0.0 }
 0x4ed   :  { %v920_v56 = vpack.c.bf16 %v918_v48, %v916_v53 }
 0x4ee   :  { %v921_v57 = vpack.c.bf16 %v919_v55, %v917_v54 }
 0x4f0   :  { %1089 = vmatprep.mubr.bf16.mxu1 %v921_v57 }
 0x4f1   :  { %1090 = vmatmul.mubr.bf16.vlgmr.msra.gmra.mrb[8].mxu1 %v920_v56 }
 0x4f2   :  { %1660 = shalt.err (!%p1657_p4)
}
 0x4f3   :  { %s1661_s19 = scalar_lea.hbm %s1986_s13, 128 }
 0x4f4   :  { %p1662_p5 = scmp.ne.s32.totalorder %s1986_s13, %s1661_s19  ;;  %p1665_p6 = scmp.lt.u32.totalorder %s1661_s19, %s1986_s13 }
 0x4f6   :  { %p1667_p7 = pnand %p1665_p6, %p1662_p5 }
 0x4f8   :  { %1670 = shalt.err (!%p1667_p7)
}
 0x4f9   :  { %1144 = dma.vmem_to_hbm [thread:$0]  %s1139_s17, 128, %s1986_s13, [#allocation4], %s1710_s30, %s1710_s30, %s1711_s25  }
 0x4fa   :  { %v1244_v60 = vld [vmem:[%s1985_s12] ss:$0 sm:$0xff]  ;;  %s1720_s7 = smov [#allocation15]  }
 0x4fb   :  { %s1150_s23 = sshll.u32 %s1720_s7, 4  ;;  %s1151_s23 = int_to_ptr.vmem [resolvable:$true] %s1150_s23 }
 0x4fc   :  { %s1671_s11 = scalar_lea.vmem %s1151_s23, 128  ;;  %p1676_p9 = scmp.lt.s32.totalorder %s1151_s23, %s1151_s23 }
 0x4fd   :  { %p1672_p8 = scmp.ne.s32.totalorder %s1151_s23, %s1671_s11  ;;  %p1677_p10 = scmp.lt.s32.totalorder %s1671_s11, %s1671_s11 }
 0x4ff   :  { %p1678_p11 = por %p1677_p10, %p1676_p9 }
 0x501   :  { %p1679_p12 = pnand %p1678_p11, %p1672_p8 }
 0x5c4   :  { %v1326_v42 = vpop.f32.mrb[8].mxu1 }
 0x5c5   :  { %v1327_v44 = vpop.f32.mrb[9].mxu1 }
 0x5c6   :  { %v1328_v58 = vadd.f32 %v1327_v44, %v1326_v42  ;;  %v1329_v59 = vpop.f32.mrb[10].mxu1 }
 0x5c7   :  { %v1330_v61 = vpop.f32.mrb[11].mxu1 }
 0x5c8   :  { %v1331_v62 = vadd.f32 %v1330_v61, %v1329_v59  ;;  %v1092_v63 = vadd.f32 %v1328_v58, %v1244_v60 }
 0x5ca   :  { %v1095_v1 = vadd.f32 %v1331_v62, %v1244_v60 }
 0x5cc   :  { %v1272_v2 = vpack.c.bf16 %v1095_v1, %v1092_v63 }
 0x5ce   :  { %1273 = vst [vmem:[#allocation15] sm:$0xff] %v1272_v2  }
 0x5cf   :  { %1682 = shalt.err (!%p1679_p12)
}
 0x5d0   :  { %s1683_s12 = scalar_lea.hbm %s1987_s14, 128 }
 0x5d1   :  { %p1684_p13 = scmp.ne.s32.totalorder %s1987_s14, %s1683_s12  ;;  %p1687_p0 = scmp.lt.u32.totalorder %s1683_s12, %s1987_s14 }
 0x5d3   :  { %p1689_p1 = pnand %p1687_p0, %p1684_p13 }
 0x5d5   :  { %1692 = shalt.err (!%p1689_p1)
}
 0x5d6   :  { %1156 = dma.vmem_to_hbm [thread:$0]  %s1151_s23, 128, %s1987_s14, [#allocation16], %s1710_s30, %s1710_s30, %s1711_s25  }
 0x5d7   :  { %1701 = dma.done.wait [#allocation4], 128  }
 0x5d8   :  { %1702 = vsyncadd [#allocation4], 4294967168 }
 0x5d9   :  { %1703 = dma.done.wait [#allocation16], 128  }
 0x5da   :  { %1704 = vsyncadd [#allocation16], 4294967168 }
 0x5db   :  { %1163 = vsyncpa [#allocation3], 1 }
 0x5dc   :  { %1164 = vsyncpa [#allocation6], 1 }
 0x5dd   :  { %1165 = vsyncpa [#allocation9], 1 }
 0x5de   :  { %1166 = vsyncpa [#allocation12], 1 }
 0x5df   :  { %1167 = vsyncpa [#allocation4], 1 }
 0x5e0   :  { %1168 = vsyncpa [#allocation16], 1 }

</bundles_post_ra>
